<compile_context>
chip_gen: v5e
topology: v5e:2x2
jax: 0.10.0
libtpu: 0.0.40
codegen_flags: <defaults>
</compile_context>

<pallas_src>
import functools

import jax
import jax.numpy as jnp
from jax import lax
from jax.experimental import pallas as pl
from jax.experimental.pallas import tpu as pltpu


def _normalized_mse_kernel(v1_ref, v2_ref, out_ref, *, d, n_rows, block_rows,
                           blocks_per_split):
    p = pl.program_id(0)          # parallel row-half (megacore axis on v7x)
    i = pl.program_id(1)          # reduction steps within this half

    @pl.when(i == 0)
    def _init():
        out_ref[...] = jnp.zeros_like(out_ref)

    v1 = v1_ref[...].astype(jnp.float32)                      # (bm, D)
    v2 = v2_ref[...].astype(jnp.float32)                      # (bm, D)

    diff = v1 - v2
    ss_d = jnp.sum(diff * diff, axis=1, keepdims=True)        # (bm, 1)
    ss_1 = jnp.sum(v1 * v1, axis=1, keepdims=True)            # (bm, 1)
    ss_2 = jnp.sum(v2 * v2, axis=1, keepdims=True)            # (bm, 1)

    # mean over features, then divide by max L2 norm via a single EUP rsqrt.
    # NOTE: norm == 0 (both rows all-zero) -> inf/NaN, matching PyTorch.
    dist = (ss_d * (1.0 / d)) * lax.rsqrt(jnp.maximum(ss_1, ss_2))   # (bm, 1)

    blk = p * blocks_per_split + i
    row_base = blk * block_rows
    full_block = row_base + block_rows <= n_rows

    @pl.when(full_block)
    def _acc_full():
        # Scalar partial broadcast-added into the whole resident tile.
        out_ref[...] += jnp.sum(dist)

    @pl.when(jnp.logical_not(full_block))
    def _acc_ragged():
        # Ragged last block (and clamped out-of-range dummy blocks): mask rows
        # past N.  select (not multiply) so NaN/inf in padded rows can't leak.
        rows = row_base + lax.broadcasted_iota(jnp.int32, dist.shape, 0)
        out_ref[...] += jnp.sum(jnp.where(rows < n_rows, dist, 0.0))


def normalized_mse(vec1, vec2, *, target_block_bytes=2 * 1024 * 1024):
    """vec1, vec2: (N, D) arrays (f32 or bf16).  Returns scalar f32 loss."""
    n, d = vec1.shape
    assert vec2.shape == (n, d), (vec1.shape, vec2.shape)
    # TODO(synk): for D < 128 (MapNet's real D=32) a lane-dense repack
    # (N,32)->(N/4,128) + MXU segment-sum would improve DMA/lane efficiency;
    # skipped here to keep the row reductions exact f32 (no MXU rounding).

    itemsize = jnp.dtype(vec1.dtype).itemsize
    align = 8 if itemsize >= 4 else (16 if itemsize == 2 else 32)
    # Size the block so each grid step does ~target_block_bytes of f32 work per
    # input (native-dtype DMA is <= that).  Keeps VMEM (2 inputs x 2 pipeline
    # buffers + f32 temporaries) well under the 32 MiB scoped limit set below.
    bm = (target_block_bytes // (d * 4)) // align * align
    bm = max(bm, align)
    if bm >= n:
        bm = n                      # single full block: no (8, .) constraint
    num_blocks = pl.cdiv(n, bm)

    n_split = 2 if num_blocks >= 2 else 1   # shard the row loop over v7x's 2 TCs
    bps = pl.cdiv(num_blocks, n_split)      # inner (reduction) steps per half

    def in_map(p_, i_):
        # Clamp trailing dummy blocks (odd block counts) to the last real
        # block; the kernel masks their contribution to zero.
        return (jnp.minimum(p_ * bps + i_, num_blocks - 1), 0)

    kernel = functools.partial(_normalized_mse_kernel, d=d, n_rows=n,
                               block_rows=bm, blocks_per_split=bps)

    partials = pl.pallas_call(
        kernel,
        out_shape=jax.ShapeDtypeStruct((n_split, 8, 128), jnp.float32),
        grid=(n_split, bps),
        in_specs=[pl.BlockSpec((bm, d), in_map),
                  pl.BlockSpec((bm, d), in_map)],
        out_specs=pl.BlockSpec((1, 8, 128), lambda p_, i_: (p_, 0, 0)),
        compiler_params=pltpu.CompilerParams(
            dimension_semantics=("parallel", "arbitrary"),
            vmem_limit_bytes=32 * 1024 * 1024),
    )(vec1, vec2)
    # Every element of a half's (8,128) tile holds that half's partial sum.
    return jnp.sum(partials[:, 0, 0]) / n


def _reference(vec1, vec2):
    """Pure-JAX transcription of the PyTorch forward (for verification)."""
    v1 = vec1.astype(jnp.float32)
    v2 = vec2.astype(jnp.float32)
    abs_dist = jnp.mean((v1 - v2) ** 2, axis=1)
    norm = jnp.maximum(jnp.linalg.norm(v1, axis=1), jnp.linalg.norm(v2, axis=1))
    return jnp.mean(abs_dist / norm)


if __name__ == "__main__":
    key = jax.random.PRNGKey(0)
    k1, k2, k3, k4, k5, k6 = jax.random.split(key, 6)

    # 1) Small shape consistent with the module (batch=8, hidden=32), f32.
    N, D = 8, 32
    v1 = jax.random.normal(k1, (N, D), dtype=jnp.float32)
    v2 = jax.random.normal(k2, (N, D), dtype=jnp.float32)
    loss = jax.block_until_ready(normalized_mse(v1, v2))
    ref = _reference(v1, v2)
    assert jnp.isfinite(loss), loss
    assert jnp.allclose(loss, ref, rtol=1e-4, atol=1e-6), (loss, ref)

    # 2) Same inputs in bf16 (native-dtype DMA, f32 math inside the kernel).
    loss_b = jax.block_until_ready(
        normalized_mse(v1.astype(jnp.bfloat16), v2.astype(jnp.bfloat16)))
    ref_b = _reference(v1.astype(jnp.bfloat16), v2.astype(jnp.bfloat16))
    assert jnp.allclose(loss_b, ref_b, rtol=1e-4, atol=1e-6), (loss_b, ref_b)

    # 3) Gridded path: multiple row blocks, 2-way parallel split, ragged last
    #    block and a clamped out-of-range dummy block (5 blocks over 2 halves).
    N2, D2 = 1040, 128
    w1 = jax.random.normal(k3, (N2, D2), dtype=jnp.float32)
    w2 = jax.random.normal(k4, (N2, D2), dtype=jnp.float32)
    loss_g = jax.block_until_ready(
        normalized_mse(w1, w2, target_block_bytes=128 * 1024))
    ref_g = _reference(w1, w2)
    assert jnp.allclose(loss_g, ref_g, rtol=1e-4, atol=1e-6), (loss_g, ref_g)

    # 4) bf16 gridded path with an odd block count (clamp + mask exercised).
    N3, D3 = 515, 64
    u1 = jax.random.normal(k5, (N3, D3), dtype=jnp.bfloat16)
    u2 = jax.random.normal(k6, (N3, D3), dtype=jnp.bfloat16)
    loss_u = jax.block_until_ready(
        normalized_mse(u1, u2, target_block_bytes=64 * 1024))
    ref_u = _reference(u1, u2)
    assert jnp.allclose(loss_u, ref_u, rtol=1e-4, atol=1e-6), (loss_u, ref_u)

    print("KERNEL_OK")
</pallas_src>

<mosaic_0001>
module attributes {stable_mosaic.version = 11 : i64} {
  func.func @_normalized_mse_kernel(%arg0: i32, %arg1: i32, %arg2: memref<8x32xf32, #tpu.memory_space<vmem>>, %arg3: memref<8x32xf32, #tpu.memory_space<vmem>>, %arg4: memref<1x8x128xf32, #tpu.memory_space<vmem>>) attributes {dimension_semantics = [#tpu.dimension_semantics<parallel>, #tpu.dimension_semantics<arbitrary>], iteration_bounds = array<i64: 1, 1>, scalar_prefetch = 0 : i64, scratch_operands = 0 : i64, tpu.core_type = #tpu.core_type<tc>, window_params = [{transform_indices = @transform_0, window_bounds = array<i64: 8, 32>}, {transform_indices = @transform_1, window_bounds = array<i64: 8, 32>}, {transform_indices = @transform_2, window_bounds = array<i64: 1, 8, 128>}]} {
    %c0_i32 = arith.constant 0 : i32
    %0 = arith.cmpi eq, %arg1, %c0_i32 : i32
    %1 = arith.extui %0 : i1 to i32
    %c0_i32_0 = arith.constant 0 : i32
    %2 = arith.cmpi ne, %1, %c0_i32_0 : i32
    scf.if %2 {
      %cst_11 = arith.constant 0.000000e+00 : f32
      %30 = vector.broadcast %cst_11 : f32 to vector<1x8x128xf32>
      %c0_12 = arith.constant 0 : index
      %c0_13 = arith.constant 0 : index
      %c0_14 = arith.constant 0 : index
      %31 = vector.load %arg4[%c0_12, %c0_13, %c0_14] : memref<1x8x128xf32, #tpu.memory_space<vmem>>, vector<1x8x128xf32>
      tpu.vector_store %arg4[%c0_12, %c0_13, %c0_14], %30 {strides = array<i32>} : memref<1x8x128xf32, #tpu.memory_space<vmem>>, vector<1x8x128xf32>,
    } else {
    }
    %c0 = arith.constant 0 : index
    %c0_1 = arith.constant 0 : index
    %3 = vector.load %arg2[%c0, %c0_1] : memref<8x32xf32, #tpu.memory_space<vmem>>, vector<8x32xf32>
    %c0_2 = arith.constant 0 : index
    %c0_3 = arith.constant 0 : index
    %4 = vector.load %arg3[%c0_2, %c0_3] : memref<8x32xf32, #tpu.memory_space<vmem>>, vector<8x32xf32>
    %5 = arith.subf %3, %4 : vector<8x32xf32>
    %6 = arith.mulf %5, %5 : vector<8x32xf32>
    %cst = arith.constant dense<0.000000e+00> : vector<8xf32>
    %7 = vector.multi_reduction <add>, %6, %cst [1] : vector<8x32xf32> to vector<8xf32>
    %8 = vector.shape_cast %7 : vector<8xf32> to vector<8x1xf32>
    %9 = arith.mulf %3, %3 : vector<8x32xf32>
    %cst_4 = arith.constant dense<0.000000e+00> : vector<8xf32>
    %10 = vector.multi_reduction <add>, %9, %cst_4 [1] : vector<8x32xf32> to vector<8xf32>
    %11 = vector.shape_cast %10 : vector<8xf32> to vector<8x1xf32>
    %12 = arith.mulf %4, %4 : vector<8x32xf32>
    %cst_5 = arith.constant dense<0.000000e+00> : vector<8xf32>
    %13 = vector.multi_reduction <add>, %12, %cst_5 [1] : vector<8x32xf32> to vector<8xf32>
    %14 = vector.shape_cast %13 : vector<8xf32> to vector<8x1xf32>
    %cst_6 = arith.constant 3.125000e-02 : f32
    %15 = vector.broadcast %cst_6 : f32 to vector<8x1xf32>
    %16 = arith.mulf %8, %15 : vector<8x1xf32>
    %17 = arith.maximumf %11, %14 : vector<8x1xf32>
    %18 = math.rsqrt %17 : vector<8x1xf32>
    %19 = arith.mulf %16, %18 : vector<8x1xf32>
    %c1_i32 = arith.constant 1 : i32
    %20 = arith.muli %arg0, %c1_i32 : i32
    %21 = arith.addi %20, %arg1 : i32
    %c8_i32 = arith.constant 8 : i32
    %22 = arith.muli %21, %c8_i32 : i32
    %c8_i32_7 = arith.constant 8 : i32
    %23 = arith.addi %22, %c8_i32_7 : i32
    %c8_i32_8 = arith.constant 8 : i32
    %24 = arith.cmpi sle, %23, %c8_i32_8 : i32
    %25 = arith.extui %24 : i1 to i32
    %c0_i32_9 = arith.constant 0 : i32
    %26 = arith.cmpi ne, %25, %c0_i32_9 : i32
    scf.if %26 {
      %c0_11 = arith.constant 0 : index
      %c0_12 = arith.constant 0 : index
      %c0_13 = arith.constant 0 : index
      %30 = vector.load %arg4[%c0_11, %c0_12, %c0_13] : memref<1x8x128xf32, #tpu.memory_space<vmem>>, vector<1x8x128xf32>
      %31 = vector.shape_cast %19 : vector<8x1xf32> to vector<1x8x1xf32>
      %cst_14 = arith.constant dense<0.000000e+00> : vector<1xf32>
      %32 = vector.multi_reduction <add>, %31, %cst_14 [1, 2] : vector<1x8x1xf32> to vector<1xf32>
      %33 = vector.shape_cast %32 : vector<1xf32> to vector<1x1x1xf32>
      %34 = vector.extract %33[0, 0, 0] : f32 from vector<1x1x1xf32>
      %35 = vector.broadcast %34 : f32 to vector<1x8x128xf32>
      %36 = arith.addf %30, %35 : vector<1x8x128xf32>
      %c0_15 = arith.constant 0 : index
      %c0_16 = arith.constant 0 : index
      %c0_17 = arith.constant 0 : index
      %37 = vector.load %arg4[%c0_15, %c0_16, %c0_17] : memref<1x8x128xf32, #tpu.memory_space<vmem>>, vector<1x8x128xf32>
      tpu.vector_store %arg4[%c0_15, %c0_16, %c0_17], %36 {strides = array<i32>} : memref<1x8x128xf32, #tpu.memory_space<vmem>>, vector<1x8x128xf32>,
    } else {
    }
    %true = arith.constant true
    %27 = arith.xori %24, %true : i1
    %28 = arith.extui %27 : i1 to i32
    %c0_i32_10 = arith.constant 0 : i32
    %29 = arith.cmpi ne, %28, %c0_i32_10 : i32
    scf.if %29 {
      %30 = tpu.iota {dimensions = array<i32: 0>} : vector<8x1xi32>
      %31 = vector.broadcast %22 : i32 to vector<8x1xi32>
      %32 = arith.addi %31, %30 : vector<8x1xi32>
      %c0_11 = arith.constant 0 : index
      %c0_12 = arith.constant 0 : index
      %c0_13 = arith.constant 0 : index
      %33 = vector.load %arg4[%c0_11, %c0_12, %c0_13] : memref<1x8x128xf32, #tpu.memory_space<vmem>>, vector<1x8x128xf32>
      %c8_i32_14 = arith.constant 8 : i32
      %34 = vector.broadcast %c8_i32_14 : i32 to vector<8x1xi32>
      %35 = arith.cmpi slt, %32, %34 : vector<8x1xi32>
      %cst_15 = arith.constant 0.000000e+00 : f32
      %36 = vector.broadcast %cst_15 : f32 to vector<8x1xf32>
      %37 = arith.select %35, %19, %36 : vector<8x1xi1>, vector<8x1xf32>
      %38 = vector.shape_cast %37 : vector<8x1xf32> to vector<1x8x1xf32>
      %cst_16 = arith.constant dense<0.000000e+00> : vector<1xf32>
      %39 = vector.multi_reduction <add>, %38, %cst_16 [1, 2] : vector<1x8x1xf32> to vector<1xf32>
      %40 = vector.shape_cast %39 : vector<1xf32> to vector<1x1x1xf32>
      %41 = vector.extract %40[0, 0, 0] : f32 from vector<1x1x1xf32>
      %42 = vector.broadcast %41 : f32 to vector<1x8x128xf32>
      %43 = arith.addf %33, %42 : vector<1x8x128xf32>
      %c0_17 = arith.constant 0 : index
      %c0_18 = arith.constant 0 : index
      %c0_19 = arith.constant 0 : index
      %44 = vector.load %arg4[%c0_17, %c0_18, %c0_19] : memref<1x8x128xf32, #tpu.memory_space<vmem>>, vector<1x8x128xf32>
      tpu.vector_store %arg4[%c0_17, %c0_18, %c0_19], %43 {strides = array<i32>} : memref<1x8x128xf32, #tpu.memory_space<vmem>>, vector<1x8x128xf32>,
    } else {
    }
    return
  }
  func.func @transform_0(%arg0: i32, %arg1: i32) -> (i32, i32) {
    %c1_i32 = arith.constant 1 : i32
    %0 = arith.muli %arg0, %c1_i32 : i32
    %1 = arith.addi %0, %arg1 : i32
    %c0_i32 = arith.constant 0 : i32
    %2 = arith.minsi %1, %c0_i32 : i32
    %c0_i32_0 = arith.constant 0 : i32
    %c0_i32_1 = arith.constant 0 : i32
    return %2, %c0_i32_0 : i32, i32
  }
  func.func @transform_1(%arg0: i32, %arg1: i32) -> (i32, i32) {
    %c1_i32 = arith.constant 1 : i32
    %0 = arith.muli %arg0, %c1_i32 : i32
    %1 = arith.addi %0, %arg1 : i32
    %c0_i32 = arith.constant 0 : i32
    %2 = arith.minsi %1, %c0_i32 : i32
    %c0_i32_0 = arith.constant 0 : i32
    %c0_i32_1 = arith.constant 0 : i32
    return %2, %c0_i32_0 : i32, i32
  }
  func.func @transform_2(%arg0: i32, %arg1: i32) -> (i32, i32, i32) {
    %c0_i32 = arith.constant 0 : i32
    %c0_i32_0 = arith.constant 0 : i32
    %c0_i32_1 = arith.constant 0 : i32
    return %arg0, %c0_i32, %c0_i32_0 : i32, i32, i32
  }
}

</mosaic_0001>

<bundles_post_ra>
// kernel: tpu_custom_call.1
= control target key start
LH: loop header
LB: loop body
LE: loop exit
PB: predicated region body
PF: predicated region fallthrough
CT: control target
= control target key end

     0   :  { %7 = vsyncpa [#allocation3], 0  ;;  %s272_s0 = inlined_call_operand.hbm [shape: f32[8,32], index: 0, kind: input, shape index: {}]   ;;  %s273_s1 = inlined_call_operand.hbm [shape: f32[8,32], index: 1, kind: input, shape index: {}]   ;;  %s274_s2 = inlined_call_operand.hbm [shape: f32[1,8,128], index: 2, kind: output, shape index: {}]  }
   0x1   :  { %8 = vsyncpa [#allocation6], 0 }
   0x2   :  { %9 = vsyncpa [#allocation4], 0  ;;  %s20_s11 = sshll.u32 %s272_s0, 4  ;;  %s245_s12 = smov [#allocation2]   ;;  %s21_s11 = int_to_ptr.hbm [resolvable:$true] %s20_s11 }
   0x3   :  { %s22_s13 = sshll.u32 %s245_s12, 4  ;;  %s36_s16 = sshll.u32 %s273_s1, 4  ;;  %s23_s13 = int_to_ptr.vmem [resolvable:$true] %s22_s13  ;;  %s37_s16 = int_to_ptr.hbm [resolvable:$true] %s36_s16 }
   0x4   :  { %25 = dma.hbm_to_vmem [thread:$0]  %s21_s11, 128, %s23_s13, [#allocation3]  }
   0x5   :  { %s246_s17 = smov [#allocation5]  }
   0x6   :  { %s38_s18 = sshll.u32 %s246_s17, 4  ;;  %s39_s18 = int_to_ptr.vmem [resolvable:$true] %s38_s18 }
   0x7   :  { %41 = dma.hbm_to_vmem [thread:$0]  %s37_s16, 128, %s39_s18, [#allocation6]  }
   0x8   :  { %239 = dma.done.wait [#allocation3], 128  }
   0x9   :  { %240 = vsyncadd [#allocation3], 4294967168 }
   0xa   :  { %241 = dma.done.wait [#allocation6], 128  }
   0xb   :  { %242 = vsyncadd [#allocation6], 4294967168  ;;  %v61_v0 = vld [vmem:[#allocation2] sm:$0xff]  ;;  %vm65_vm0 = vcmask 261120   ;;  %v62_v1 = vld [vmem:[#allocation5] sm:$0xff]  ;;  %vm98_vm4 = vcmask 7168  }
   0xc   :  { %v69_v2 = vmul.f32 %v61_v0, %v61_v0  ;;  %v63_v3 = vsub.f32 %v61_v0, %v62_v1  ;;  %v73_v6 = vmul.f32 %v62_v1, %v62_v1  ;;  %s247_s0 = smov [#allocation7]   ;;  %s144_s21 = sshll.u32 %s274_s2, 4  ;;  %s145_s21 = int_to_ptr.hbm [resolvable:$true] %s144_s21 }
   0xd   :  { %s142_s1 = sshll.u32 %s247_s0, 4  ;;  %s143_s1 = int_to_ptr.vmem [resolvable:$true] %s142_s1 }
   0xe   :  { %v70_v4 = vsel %vm65_vm0, %v69_v2, 0.0  ;;  %v64_v5 = vmul.f32 %v63_v3, %v63_v3  ;;  %v74_v8 = vsel %vm65_vm0, %v73_v6, 0.0 }
   0xf   :  { %71 = vadd.xlane.f32.xlu0 %v70_v4 }
  0x10   :  { %v66_v7 = vsel %vm65_vm0, %v64_v5, 0.0 }
  0x11   :  { %67 = vadd.xlane.f32.xlu1 %v66_v7 }
  0x17   :  { %75 = vadd.xlane.f32.xlu0 %v74_v8 }
  0x82   :  { %v72_v9 = vpop.xlane.xlu0 %71 }
  0x84   :  { %v68_v16 = vpop.xlane.xlu1 %67 }
  0x85   :  { %v77_v18 = vmul.f32 0.03125, %v68_v16 }
  0x8a   :  { %v76_v10 = vpop.xlane.xlu0 %75 }
  0x8b   :  { %v78_v11 = vmax.f32 %v72_v9, %v76_v10 }
  0x8d   :  { %165 = vrsqrt.f32 %v78_v11  ;;  %vm85_vm2 = vweird.f32 %v78_v11 }
  0x93   :  { %v166_v12 = vpop.eup %165 }
  0x94   :  { %v80_v13 = vmul.f32 %v166_v12, %v78_v11  ;;  %vm86_vm1 = vweird.f32 %v166_v12 }
  0x95   :  { %vm87_vm3 = vmor %vm85_vm2, %vm86_vm1 }
  0x96   :  { %v81_v14 = vmul.f32 %v166_v12, %v80_v13 }
  0x98   :  { %v82_v15 = vmul.f32 0.5, %v81_v14 }
  0x9a   :  { %v83_v17 = vsub.f32 1.5, %v82_v15 }
  0x9c   :  { %v84_v19 = vmul.f32 %v166_v12, %v83_v17 }
  0x9e   :  { %v88_v20 = vsel %vm87_vm3, %v166_v12, %v84_v19 }
  0x9f   :  { %v89_v21 = vmul.f32 %v88_v20, %v77_v18 }
  0xa1   :  { %v99_v22 = vsel %vm98_vm4, %v89_v21, 0.0 }
  0xa2   :  { %100 = vadd.xlane.f32.xlu1 %v99_v22 }
 0x115   :  { %v101_v23 = vpop.xlane.xlu1 %100 }
 0x116   :  { %v102_v24 = vrot.slane %v101_v23, 4 }
 0x118   :  { %v103_v25 = vadd.f32 %v102_v24, %v101_v23 }
 0x11a   :  { %v104_v26 = vrot.slane %v103_v25, 2 }
 0x11c   :  { %v105_v27 = vadd.f32 %v104_v26, %v103_v25 }
 0x11e   :  { %v106_v28 = vrot.slane %v105_v27, 1 }
 0x120   :  { %v107_v29 = vadd.f32 %v106_v28, %v105_v27 }
 0x122   :  { %159 = vpush %v107_v29 }
 0x153   :  { %s160_s22 = spop %159 }
 0x154   :  { %v109_v30 = vstv %s160_s22 }
 0x155   :  { %111 = vst [vmem:[#allocation7] sm:$0xff] %v109_v30 }
 0x156   :  { %147 = dma.vmem_to_hbm [thread:$0]  %s143_s1, 128, %s145_s21, [#allocation4]  }
 0x157   :  { %243 = dma.done.wait [#allocation4], 128  }
 0x158   :  { %244 = vsyncadd [#allocation4], 4294967168 }
 0x159   :  { %152 = vsyncpa [#allocation3], 1 }
 0x15a   :  { %153 = vsyncpa [#allocation6], 1 }
 0x15b   :  { %154 = vsyncpa [#allocation4], 1 }

</bundles_post_ra>
